<compile_context>
chip_gen: v6e
topology: v6e:2x2x1
jax: 0.10.0
libtpu: 0.0.40
codegen_flags: <defaults>
</compile_context>

<pallas_src>
import functools

import jax
import jax.numpy as jnp
import numpy as np
from jax.experimental import pallas as pl
from jax.experimental.pallas import tpu as pltpu

FEAT_DIM = 512          # self.fc = nn.Linear(512, numclass)
KSIZE = 3
PAD = 1
LANE = 128


def _round_up(x, m):
    return ((x + m - 1) // m) * m


def _default_tile_hw_target():
    """8192-row spatial tiles on 128 MiB-VMEM chips (v5e/v6e), 4096 on v7x."""
    try:
        info = pltpu.get_tpu_info()
        vmem = getattr(info, "vmem_capacity_bytes", 0) or 0
        if vmem >= (100 << 20):
            return 8192
    except Exception:
        pass
    return 4096


def _pick_tile_hw(hw, target):
    """Largest spatial tile <= target that divides HW exactly.

    Prefers multiples of 256 (keeps the 256x256 MXU on v6e/v7x fully fed),
    then 128 (v5e MXU width), then 16 (bf16 sublane packing), then 8.
    Falls back to the full extent, which is always a legal block.
    """
    cand = min(target, hw)
    for align in (256, 128, 16, 8):
        t = cand - (cand % align)
        while t >= align:
            if hw % t == 0:
                return t
            t -= align
    return hw


# ----------------------------------------------------------------------------
# Fused kernel: conv-as-matmul + ReLU + global-average-pool + FC
# ----------------------------------------------------------------------------
def _fused_network_kernel(p_ref, cw_ref, cb_ref, fw_ref, fb_ref,
                          logits_ref, feat_ref, acc_ref, *, inv_hw):
    # p_ref:      (1, TILE_HW, CK)      bf16 im2col patches (CK = C*k*k, unpadded)
    # cw_ref:     (CK, FEAT)            bf16 conv weight, im2col layout
    # cb_ref:     (1, FEAT)             f32 conv bias
    # fw_ref:     (FEAT, N_PAD)         f32 fc weight, pre-transposed, lane padded
    # fb_ref:     (1, N_PAD)            f32 fc bias, lane padded
    # logits_ref: (1, 1, N_PAD)         f32 logits (resident across the HW axis)
    # feat_ref:   (1, 1, FEAT)          f32 pooled features
    # acc_ref:    (8, FEAT)             f32 strip-wise running spatial sum
    hw_idx = pl.program_id(1)

    @pl.when(hw_idx == 0)
    def _init():
        acc_ref[...] = jnp.zeros_like(acc_ref)

    # Conv-as-matmul on the MXU (K = CK, Mosaic pads K internally so there is
    # no HBM-side padding cost), f32 accumulation, bias + ReLU on the VPU.
    feat = jnp.dot(p_ref[0], cw_ref[...], preferred_element_type=jnp.float32)
    feat = jnp.maximum(feat + cb_ref[...], 0.0)           # (TILE_HW, FEAT)

    # Global-average-pool contribution of this tile, accumulated strip-wise:
    # 8-row strips summed on the VPU every step; the cross-sublane 8 -> 1
    # reduce (XLU) and the narrow store happen only once, in finalize.
    tile_rows = feat.shape[0]
    if tile_rows % 8 == 0:
        acc_ref[...] += jnp.sum(
            feat.reshape(tile_rows // 8, 8, FEAT_DIM), axis=0)
    else:   # tiny / oddly-shaped images: plain cross-sublane sum into row 0
        acc_ref[0:1, :] += jnp.sum(feat, axis=0, keepdims=True)

    # Finalize on the last spatial tile: pool scale + fused FC (tiny, resident).
    @pl.when(hw_idx == pl.num_programs(1) - 1)
    def _finalize():
        pooled = jnp.sum(acc_ref[...], axis=0, keepdims=True) * inv_hw  # (1, FEAT)
        logits = jnp.dot(pooled, fw_ref[...],
                         preferred_element_type=jnp.float32) + fb_ref[...]
        feat_ref[...] = pooled.reshape(feat_ref.shape)
        logits_ref[...] = logits.reshape(logits_ref.shape)


def _fused_forward(patches, conv_w, conv_b, fc_w, fc_b, *, batch, hw, tile_hw):
    ck = patches.shape[-1]
    n_pad = fc_w.shape[-1]
    n_hw_tiles = hw // tile_hw

    kernel = functools.partial(_fused_network_kernel, inv_hw=1.0 / hw)

    # Explicit VMEM budget: double-buffered patch tile + resident weights +
    # the (TILE_HW, 512) f32 feature temporary (the largest consumer).
    est = (2 * tile_hw * ck * 2          # patch tile, bf16, double-buffered
           + 2 * ck * FEAT_DIM * 2       # conv weight, bf16
           + 2 * FEAT_DIM * n_pad * 4    # fc weight, f32
           + 4 * (FEAT_DIM + n_pad) * 4  # biases / output blocks
           + 8 * FEAT_DIM * 4            # strip accumulator scratch
           + tile_hw * FEAT_DIM * 4)     # in-kernel f32 feature tile
    vmem_limit = int(min(max(2 * est, 16 << 20), 48 << 20))   # v7x-safe cap

    cost = pl.CostEstimate(
        flops=int(2 * batch * hw * ck * FEAT_DIM
                  + 3 * batch * hw * FEAT_DIM
                  + 2 * batch * FEAT_DIM * n_pad),
        transcendentals=0,
        bytes_accessed=int(patches.size * 2 + conv_w.size * 2
                           + fc_w.size * 4 + batch * (n_pad + FEAT_DIM) * 4),
    )

    grid_spec = pltpu.PrefetchScalarGridSpec(
        num_scalar_prefetch=0,
        grid=(batch, n_hw_tiles),
        in_specs=[
            pl.BlockSpec((1, tile_hw, ck), lambda b, h: (b, h, 0)),
            pl.BlockSpec((ck, FEAT_DIM), lambda b, h: (0, 0)),
            pl.BlockSpec((1, FEAT_DIM), lambda b, h: (0, 0)),
            pl.BlockSpec((FEAT_DIM, n_pad), lambda b, h: (0, 0)),
            pl.BlockSpec((1, n_pad), lambda b, h: (0, 0)),
        ],
        out_specs=[
            pl.BlockSpec((1, 1, n_pad), lambda b, h: (b, 0, 0)),
            pl.BlockSpec((1, 1, FEAT_DIM), lambda b, h: (b, 0, 0)),
        ],
        scratch_shapes=[pltpu.VMEM((8, FEAT_DIM), jnp.float32)],
    )

    logits, feats = pl.pallas_call(
        kernel,
        out_shape=(jax.ShapeDtypeStruct((batch, 1, n_pad), jnp.float32),
                   jax.ShapeDtypeStruct((batch, 1, FEAT_DIM), jnp.float32)),
        grid_spec=grid_spec,
        compiler_params=pltpu.CompilerParams(
            dimension_semantics=("parallel", "arbitrary"),
            vmem_limit_bytes=vmem_limit),
        cost_estimate=cost,
    )(patches, conv_w, conv_b, fc_w, fc_b)
    return logits.reshape(batch, n_pad), feats.reshape(batch, FEAT_DIM)


# ----------------------------------------------------------------------------
# Glue: bf16 im2col in (B, HW, CK) layout -- CK left UNPADDED (no 128 padding
# in HBM; the kernel's matmul pads K internally at zero memory cost).
# ----------------------------------------------------------------------------
def im2col_bf16(x_nchw, k=KSIZE, pad=PAD):
    # TODO(synk): form patches in-kernel from a halo'd (rows, W*C) band via
    # manual DMA + pltpu.roll to kill the 9x im2col HBM expansion entirely.
    x = x_nchw.astype(jnp.bfloat16)        # bf16 glue halves every XLA temporary
    b, c, h, w = x.shape
    xp = jnp.pad(x, ((0, 0), (0, 0), (pad, pad), (pad, pad)))
    taps = [xp[:, :, dy:dy + h, dx:dx + w] for dy in range(k) for dx in range(k)]
    p = jnp.stack(taps, axis=-1)           # (B, C, H, W, k*k)
    p = p.transpose(0, 2, 3, 1, 4)         # (B, H, W, C, k*k)
    return p.reshape(b, h * w, c * k * k)  # last dim = CK (36 for C=4)


# ----------------------------------------------------------------------------
# Module wrapper
# ----------------------------------------------------------------------------
class Network:
    """JAX/Pallas equivalent of the PyTorch `network` module."""

    def __init__(self, numclass, in_channels, key, tile_hw_target=None):
        k1, k2, k3, k4 = jax.random.split(key, 4)
        ck = in_channels * KSIZE * KSIZE
        # synthetic feature extractor: Conv2d(Cin, 512, 3, padding=1) -> ReLU -> GAP
        self.conv_w = jax.random.normal(k1, (FEAT_DIM, in_channels, KSIZE, KSIZE),
                                        jnp.float32) * (1.0 / np.sqrt(ck))
        self.conv_b = jax.random.normal(k2, (FEAT_DIM,), jnp.float32) * 0.01
        # fc = nn.Linear(512, numclass, bias=True)
        self.fc_w = jax.random.normal(k3, (numclass, FEAT_DIM),
                                      jnp.float32) * (1.0 / np.sqrt(FEAT_DIM))
        self.fc_b = jax.random.normal(k4, (numclass,), jnp.float32) * 0.01

        self.in_channels = in_channels
        self.numclass = numclass
        self.ck = ck
        self.tile_hw_target = (tile_hw_target if tile_hw_target is not None
                               else _default_tile_hw_target())
        self._pack_params()

    def _pack_params(self):
        self.n_pad = _round_up(self.numclass, LANE)        # lane-dense logits
        # NOTE: conv operands are bf16 (MXU-friendly); this is a precision
        # choice relative to a true f32 Conv2d and is mirrored by the reference.
        w_mat = self.conv_w.reshape(FEAT_DIM, self.ck).T   # (ck, 512)
        self.conv_w_mat = w_mat.astype(jnp.bfloat16)
        self.conv_b_row = self.conv_b.reshape(1, FEAT_DIM)
        fc_w_t = jnp.pad(self.fc_w.T, ((0, 0), (0, self.n_pad - self.numclass)))
        self.fc_w_pad = fc_w_t.astype(jnp.float32)         # tiny & resident -> f32
        self.fc_b_pad = jnp.pad(self.fc_b,
                                (0, self.n_pad - self.numclass)).reshape(1, -1)

    def _forward(self, x_nchw):
        b, _, h, w = x_nchw.shape
        hw = h * w
        patches = im2col_bf16(x_nchw)
        tile_hw = _pick_tile_hw(hw, self.tile_hw_target)
        logits_pad, feats = _fused_forward(
            patches, self.conv_w_mat, self.conv_b_row,
            self.fc_w_pad, self.fc_b_pad, batch=b, hw=hw, tile_hw=tile_hw)
        return logits_pad[:, :self.numclass], feats

    def __call__(self, x_nchw):
        return self._forward(x_nchw)[0]

    def feature(self, x_nchw):
        return self._forward(x_nchw)[1]

    feature_extractor = feature

    def Incremental_learning(self, numclass, key=None):
        # Pure parameter surgery (matches the PyTorch method); no kernel compute.
        old_w, old_b, old_n = self.fc_w, self.fc_b, self.numclass
        key = jax.random.PRNGKey(1) if key is None else key
        kw, kb = jax.random.split(key)
        new_w = jax.random.normal(kw, (numclass, FEAT_DIM), jnp.float32) / np.sqrt(FEAT_DIM)
        new_b = jax.random.normal(kb, (numclass,), jnp.float32) * 0.01
        self.fc_w = new_w.at[:old_n].set(old_w[:old_n])
        self.fc_b = new_b.at[:old_n].set(old_b[:old_n])
        self.numclass = numclass
        self._pack_params()


# ----------------------------------------------------------------------------
# Pure-jnp reference (mirrors the kernel's bf16 conv matmul quantization)
# ----------------------------------------------------------------------------
def reference_forward(net, x_nchw):
    b, _, h, w = x_nchw.shape
    hw = h * w
    patches = im2col_bf16(x_nchw)
    feat = jnp.dot(patches.reshape(b * hw, net.ck), net.conv_w_mat,
                   preferred_element_type=jnp.float32)
    feat = jnp.maximum(feat + net.conv_b_row, 0.0)
    pooled = feat.reshape(b, hw, FEAT_DIM).mean(axis=1)
    logits = jnp.dot(pooled, net.fc_w_pad,
                     preferred_element_type=jnp.float32) + net.fc_b_pad
    return logits[:, :net.numclass], pooled


if __name__ == "__main__":
    key = jax.random.PRNGKey(0)
    k_in, k_net = jax.random.split(key)

    B, C, H, W = 2, 4, 16, 16
    NUMCLASS = 10

    x = jax.random.normal(k_in, (B, C, H, W), jnp.float32)   # NCHW input

    # tile_hw_target=128 -> 2 spatial tiles per batch element at this size,
    # exercising the init / strip-accumulate / finalize path on the
    # 'arbitrary' spatial axis.
    net = Network(NUMCLASS, in_channels=C, key=k_net, tile_hw_target=128)

    logits = jax.block_until_ready(net(x))
    feats = jax.block_until_ready(net.feature(x))

    ref_logits, ref_feats = reference_forward(net, x)
    np.testing.assert_allclose(np.asarray(logits), np.asarray(ref_logits),
                               rtol=2e-3, atol=2e-3)
    np.testing.assert_allclose(np.asarray(feats), np.asarray(ref_feats),
                               rtol=2e-3, atol=2e-3)
    assert logits.shape == (B, NUMCLASS)
    assert feats.shape == (B, FEAT_DIM)

    # Default (large-tile) configuration: single spatial tile at this size,
    # must give the same result.
    net2 = Network(NUMCLASS, in_channels=C, key=k_net)
    logits2 = jax.block_until_ready(net2(x))
    np.testing.assert_allclose(np.asarray(logits2), np.asarray(ref_logits),
                               rtol=2e-3, atol=2e-3)

    print("KERNEL_OK")
</pallas_src>

<mosaic_0001>
module attributes {stable_mosaic.version = 11 : i64} {
  func.func @_fused_network_kernel(%arg0: i32, %arg1: i32, %arg2: memref<1x128x36xbf16, #tpu.memory_space<vmem>>, %arg3: memref<36x512xbf16, #tpu.memory_space<vmem>>, %arg4: memref<1x512xf32, #tpu.memory_space<vmem>>, %arg5: memref<512x128xf32, #tpu.memory_space<vmem>>, %arg6: memref<1x128xf32, #tpu.memory_space<vmem>>, %arg7: memref<1x1x128xf32, #tpu.memory_space<vmem>>, %arg8: memref<1x1x512xf32, #tpu.memory_space<vmem>>, %arg9: memref<8x512xf32, #tpu.memory_space<vmem>>) attributes {dimension_semantics = [#tpu.dimension_semantics<parallel>, #tpu.dimension_semantics<arbitrary>], iteration_bounds = array<i64: 2, 2>, scalar_prefetch = 0 : i64, scratch_operands = 1 : i64, tpu.core_type = #tpu.core_type<tc>, window_params = [{transform_indices = @transform_0, window_bounds = array<i64: 1, 128, 36>}, {pipeline_mode = #tpu.pipeline_mode<synchronous>, transform_indices = @transform_1, window_bounds = array<i64: 36, 512>}, {pipeline_mode = #tpu.pipeline_mode<synchronous>, transform_indices = @transform_2, window_bounds = array<i64: 1, 512>}, {pipeline_mode = #tpu.pipeline_mode<synchronous>, transform_indices = @transform_3, window_bounds = array<i64: 512, 128>}, {pipeline_mode = #tpu.pipeline_mode<synchronous>, transform_indices = @transform_4, window_bounds = array<i64: 1, 128>}, {transform_indices = @transform_5, window_bounds = array<i64: 1, 1, 128>}, {transform_indices = @transform_6, window_bounds = array<i64: 1, 1, 512>}]} {
    %c0_i32 = arith.constant 0 : i32
    %0 = arith.cmpi eq, %arg1, %c0_i32 : i32
    %1 = arith.extui %0 : i1 to i32
    %c0_i32_0 = arith.constant 0 : i32
    %2 = arith.cmpi ne, %1, %c0_i32_0 : i32
    scf.if %2 {
      %cst_14 = arith.constant 0.000000e+00 : f32
      %20 = vector.broadcast %cst_14 : f32 to vector<8x512xf32>
      %c0_15 = arith.constant 0 : index
      %c0_16 = arith.constant 0 : index
      %21 = vector.load %arg9[%c0_15, %c0_16] : memref<8x512xf32, #tpu.memory_space<vmem>>, vector<8x512xf32>
      tpu.vector_store %arg9[%c0_15, %c0_16], %20 {strides = array<i32>} : memref<8x512xf32, #tpu.memory_space<vmem>>, vector<8x512xf32>,
    } else {
    }
    %c0 = arith.constant 0 : index
    %c0_1 = arith.constant 0 : index
    %c0_2 = arith.constant 0 : index
    %3 = vector.load %arg2[%c0, %c0_1, %c0_2] : memref<1x128x36xbf16, #tpu.memory_space<vmem>>, vector<1x128x36xbf16>
    %4 = vector.shape_cast %3 : vector<1x128x36xbf16> to vector<128x36xbf16>
    %c0_3 = arith.constant 0 : index
    %c0_4 = arith.constant 0 : index
    %5 = vector.load %arg3[%c0_3, %c0_4] : memref<36x512xbf16, #tpu.memory_space<vmem>>, vector<36x512xbf16>
    %cst = arith.constant dense<0.000000e+00> : vector<128x512xf32>
    %6 = tpu.matmul %4, %5, %cst {dimension_numbers = #tpu.dot_dimension_numbers<[1], [0], [0], [1], [0, 0, 1, 1], [], []>} : vector<128x36xbf16>, vector<36x512xbf16>, vector<128x512xf32> -> vector<128x512xf32>
    %c0_5 = arith.constant 0 : index
    %c0_6 = arith.constant 0 : index
    %7 = vector.load %arg4[%c0_5, %c0_6] : memref<1x512xf32, #tpu.memory_space<vmem>>, vector<1x512xf32>
    %8 = vector.broadcast %7 : vector<1x512xf32> to vector<128x512xf32>
    %9 = arith.addf %6, %8 : vector<128x512xf32>
    %cst_7 = arith.constant 0.000000e+00 : f32
    %10 = vector.broadcast %cst_7 : f32 to vector<128x512xf32>
    %11 = arith.maximumf %9, %10 : vector<128x512xf32>
    %c0_8 = arith.constant 0 : index
    %c0_9 = arith.constant 0 : index
    %12 = vector.load %arg9[%c0_8, %c0_9] : memref<8x512xf32, #tpu.memory_space<vmem>>, vector<8x512xf32>
    %13 = vector.shape_cast %11 : vector<128x512xf32> to vector<16x8x512xf32>
    %cst_10 = arith.constant dense<0.000000e+00> : vector<8x512xf32>
    %14 = vector.multi_reduction <add>, %13, %cst_10 [0] : vector<16x8x512xf32> to vector<8x512xf32>
    %15 = arith.addf %12, %14 : vector<8x512xf32>
    %c0_11 = arith.constant 0 : index
    %c0_12 = arith.constant 0 : index
    %16 = vector.load %arg9[%c0_11, %c0_12] : memref<8x512xf32, #tpu.memory_space<vmem>>, vector<8x512xf32>
    tpu.vector_store %arg9[%c0_11, %c0_12], %15 {strides = array<i32>} : memref<8x512xf32, #tpu.memory_space<vmem>>, vector<8x512xf32>,
    %c1_i32 = arith.constant 1 : i32
    %17 = arith.cmpi eq, %arg1, %c1_i32 : i32
    %18 = arith.extui %17 : i1 to i32
    %c0_i32_13 = arith.constant 0 : i32
    %19 = arith.cmpi ne, %18, %c0_i32_13 : i32
    scf.if %19 {
      %c0_14 = arith.constant 0 : index
      %c0_15 = arith.constant 0 : index
      %20 = vector.load %arg9[%c0_14, %c0_15] : memref<8x512xf32, #tpu.memory_space<vmem>>, vector<8x512xf32>
      %cst_16 = arith.constant dense<0.000000e+00> : vector<512xf32>
      %21 = vector.multi_reduction <add>, %20, %cst_16 [0] : vector<8x512xf32> to vector<512xf32>
      %22 = vector.shape_cast %21 : vector<512xf32> to vector<1x512xf32>
      %cst_17 = arith.constant 3.906250e-03 : f32
      %23 = vector.broadcast %cst_17 : f32 to vector<1x512xf32>
      %24 = arith.mulf %22, %23 : vector<1x512xf32>
      %c0_18 = arith.constant 0 : index
      %c0_19 = arith.constant 0 : index
      %25 = vector.load %arg5[%c0_18, %c0_19] : memref<512x128xf32, #tpu.memory_space<vmem>>, vector<512x128xf32>
      %cst_20 = arith.constant dense<0.000000e+00> : vector<1x128xf32>
      %26 = tpu.matmul %24, %25, %cst_20 {dimension_numbers = #tpu.dot_dimension_numbers<[1], [0], [0], [1], [0, 0, 1, 1], [], []>} : vector<1x512xf32>, vector<512x128xf32>, vector<1x128xf32> -> vector<1x128xf32>
      %c0_21 = arith.constant 0 : index
      %c0_22 = arith.constant 0 : index
      %27 = vector.load %arg6[%c0_21, %c0_22] : memref<1x128xf32, #tpu.memory_space<vmem>>, vector<1x128xf32>
      %28 = arith.addf %26, %27 : vector<1x128xf32>
      %29 = vector.shape_cast %24 : vector<1x512xf32> to vector<1x1x512xf32>
      %c0_23 = arith.constant 0 : index
      %c0_24 = arith.constant 0 : index
      %c0_25 = arith.constant 0 : index
      %30 = vector.load %arg8[%c0_23, %c0_24, %c0_25] : memref<1x1x512xf32, #tpu.memory_space<vmem>>, vector<1x1x512xf32>
      tpu.vector_store %arg8[%c0_23, %c0_24, %c0_25], %29 {strides = array<i32>} : memref<1x1x512xf32, #tpu.memory_space<vmem>>, vector<1x1x512xf32>,
      %31 = vector.shape_cast %28 : vector<1x128xf32> to vector<1x1x128xf32>
      %c0_26 = arith.constant 0 : index
      %c0_27 = arith.constant 0 : index
      %c0_28 = arith.constant 0 : index
      %32 = vector.load %arg7[%c0_26, %c0_27, %c0_28] : memref<1x1x128xf32, #tpu.memory_space<vmem>>, vector<1x1x128xf32>
      tpu.vector_store %arg7[%c0_26, %c0_27, %c0_28], %31 {strides = array<i32>} : memref<1x1x128xf32, #tpu.memory_space<vmem>>, vector<1x1x128xf32>,
    } else {
    }
    return
  }
  func.func @transform_0(%arg0: i32, %arg1: i32) -> (i32, i32, i32) {
    %c0_i32 = arith.constant 0 : i32
    %c0_i32_0 = arith.constant 0 : i32
    return %arg0, %arg1, %c0_i32 : i32, i32, i32
  }
  func.func @transform_1(%arg0: i32, %arg1: i32) -> (i32, i32) {
    %c0_i32 = arith.constant 0 : i32
    %c0_i32_0 = arith.constant 0 : i32
    %c0_i32_1 = arith.constant 0 : i32
    return %c0_i32, %c0_i32_0 : i32, i32
  }
  func.func @transform_2(%arg0: i32, %arg1: i32) -> (i32, i32) {
    %c0_i32 = arith.constant 0 : i32
    %c0_i32_0 = arith.constant 0 : i32
    %c0_i32_1 = arith.constant 0 : i32
    return %c0_i32, %c0_i32_0 : i32, i32
  }
  func.func @transform_3(%arg0: i32, %arg1: i32) -> (i32, i32) {
    %c0_i32 = arith.constant 0 : i32
    %c0_i32_0 = arith.constant 0 : i32
    %c0_i32_1 = arith.constant 0 : i32
    return %c0_i32, %c0_i32_0 : i32, i32
  }
  func.func @transform_4(%arg0: i32, %arg1: i32) -> (i32, i32) {
    %c0_i32 = arith.constant 0 : i32
    %c0_i32_0 = arith.constant 0 : i32
    %c0_i32_1 = arith.constant 0 : i32
    return %c0_i32, %c0_i32_0 : i32, i32
  }
  func.func @transform_5(%arg0: i32, %arg1: i32) -> (i32, i32, i32) {
    %c0_i32 = arith.constant 0 : i32
    %c0_i32_0 = arith.constant 0 : i32
    %c0_i32_1 = arith.constant 0 : i32
    return %arg0, %c0_i32, %c0_i32_0 : i32, i32, i32
  }
  func.func @transform_6(%arg0: i32, %arg1: i32) -> (i32, i32, i32) {
    %c0_i32 = arith.constant 0 : i32
    %c0_i32_0 = arith.constant 0 : i32
    %c0_i32_1 = arith.constant 0 : i32
    return %arg0, %c0_i32, %c0_i32_0 : i32, i32, i32
  }
}

</mosaic_0001>

<bundles_post_ra>
// kernel: tpu_custom_call.1
= control target key start
LH: loop header
LB: loop body
LE: loop exit
PB: predicated region body
PF: predicated region fallthrough
CT: control target
= control target key end

     0   :  { %s2039_s0 = inlined_call_operand.vmem [shape: bf16[2,256,36], index: 0, kind: input, shape index: {}]   ;;  %s2040_s1 = inlined_call_operand.vmem [shape: bf16[36,512], index: 1, kind: input, shape index: {}]   ;;  %s2041_s2 = inlined_call_operand.vmem [shape: f32[1,512], index: 2, kind: input, shape index: {}]   ;;  %s2042_s3 = inlined_call_operand.hbm [shape: f32[512,128], index: 3, kind: input, shape index: {}]   ;;  %s2043_s4 = inlined_call_operand.vmem [shape: f32[1,128], index: 4, kind: input, shape index: {}]   ;;  %s2044_s5 = inlined_call_operand.hbm [shape: f32[2,1,128], index: 5, kind: output, shape index: {0}]   ;;  %s2045_s6 = inlined_call_operand.hbm [shape: f32[2,1,512], index: 6, kind: output, shape index: {1}]  }
   0x1   :  { %2046 = sst [smem:[#allocation12_spill]] %s2039_s0 }
   0x2   :  { %2047 = sst [smem:[#allocation13_spill]] %s2040_s1 }
   0x3   :  { %2048 = sst [smem:[#allocation14_spill]] %s2042_s3 }
   0x4   :  { %12 = vsyncpa [#allocation4], 0 }
   0x5   :  { %13 = vsyncpa [#allocation5], 0 }
   0x6   :  { %15 = vsyncpa [#allocation5 + $0x1], 0 }
   0x7   :  { %16 = vsyncpa [#allocation8], 0 }
   0x8   :  { %18 = vsyncpa [#allocation8 + $0x1], 0  ;;  %s1715_s21 = smov 0   ;;  %s1717_s22 = smov 0  }
   0x9   :  { %s1719_s23 = smov 0   ;;  %s1721_s24 = smov 0  }
   0xa   :  { %s1723_s25 = smov 0   ;;  %s1725_s26 = smov 0  }
   0xb   :  { %s1727_s27 = smov 0   ;;  %s1729_s28 = smov 0  }
   0xc LB: > { %s1274_s29 = sadd.s32 4294967295, %s1670_s28   ;;  %s1275_s30 = sadd.s32 4294967294, %s1670_s28   ;;  %s1670_s28 = sphi %s1729_s28, %s24_s28   ;;  %s1666_s27 = sphi %s1727_s27, %s2065_s27   ;;  %s1662_s26 = sphi %s1725_s26, %s2064_s26   ;;  %s1658_s25 = sphi %s1723_s25, %s2063_s25   ;;  %s1654_s24 = sphi %s1721_s24, %s2062_s24   ;;  %s1650_s23 = sphi %s1719_s23, %s2061_s23   ;;  %s1646_s22 = sphi %s1717_s22, %s2060_s22   ;;  %s1642_s21 = sphi %s1715_s21, %s2059_s21  }
   0xd   : > { %s33_s7 = sadd.s32 1, %s1662_s26  ;;  %s36_s8 = sadd.s32 1, %s1666_s27 }
   0xe   : > { %p34_p0 = scmp.ge.s32.totalorder %s33_s7, 2  ;;  %s155_s9 = sadd.s32 1, %s1650_s23 }
   0xf   : > { %p165_p1 = scmp.ne.s32.totalorder %s1650_s23, %s1646_s22  ;;  %p166_p2 = scmp.eq.s32.totalorder %s1274_s29, 3 }
  0x10   : > { %s2067_s7 = smov (%p34_p0, %s33_s7), 0  ;;  %s2069_s8 = smov (!%p34_p0, %s36_s8), %s1666_s27 }
  0x11   : > { %p1765_p3 = por %p166_p2, %p165_p1  ;;  %p171_p4 = scmp.ne.s32.totalorder %s1646_s22, %s1642_s21 }
  0x12   : > { %p38_p5 = scmp.ge.s32.totalorder %s2069_s8, 2  ;;  %p172_p6 = scmp.eq.s32.totalorder %s1275_s30, 3 }
  0x13   : > { %p1276_p7 = scmp.ge.s32.totalorder %s1670_s28, 1  ;;  %p205_p8 = scmp.lt.s32.totalorder %s1670_s28, 5 }
  0x14   : > { %s2071_s8 = smov (%p38_p5, %s2069_s8), 0  ;;  %p1775_p9 = por %p172_p6, %p171_p4 }
  0x15   : > { %p1779_p10 = pnand %p1276_p7, %p205_p8  ;;  %s152_s13 = ssub.s32 %s1666_s27, %s2071_s8 }
  0x16   : > { %p153_p11 = scmp.eq.s32.totalorder %s152_s13, 0  ;;  %p1787_p13 = scmp.eq.s32.totalorder %s1274_s29, 0 }
  0x17   : > { %p1410_p12 = pneg %p1779_p10  ;;  %s1672_s16 = smov [#allocation3]  }
  0x18   : > { %s1792_s15 = scalar_select %p153_p11, %s1650_s23, %s155_s9  }
  0x19   : > { %s223_s17 = sshll.u32 %s1672_s16, 4  ;;  %p1796_p0 = pnand %p1787_p13, %p1410_p12  ;;  %s224_s17 = int_to_ptr.vmem [resolvable:$true] %s223_s17 }
  0x1a   : > { %s1529_s19 = scalar_lea.vmem %s224_s17, 8192  ;;  %p1537_p6 = scmp.lt.s32.totalorder %s224_s17, %s224_s17 }
  0x1b   : > { %p1520_p1 = pneg %p1796_p0  ;;  %p1530_p2 = scmp.ne.s32.totalorder %s224_s17, %s1529_s19 }
  0x1c   : > { %p1538_p7 = scmp.lt.s32.totalorder %s1529_s19, %s1529_s19 }
  0x1d   : > { %p1532_p4 = pnand %p1530_p2, %p1520_p1 }
  0x1e   : > { %p1539_p8 = por %p1538_p7, %p1537_p6 }
  0x1f   : > { %p1533_p5 = pneg %p1532_p4 }
  0x21   : > { %p1540_p11 = pnand %p1539_p8, %p1533_p5 }
  0x23   : > { %1543 = shalt.err (!%p1540_p11)
}
  0x24   : > { %s1673_s20 = smov 128   ;;  %s1674_s29 = smov 8  }
  0x25   : > { %s2054_s3 = sld [smem:[#allocation14_spill]] }
  0x27   : > { %255 = sbr.rel (%p1779_p10) target bundleno = 629 (0x275), region = 40 }
  0x2b   : > { %1413 = dma.hbm_to_vmem [thread:$0]  (!%p1796_p0), %s2054_s3, 8192, %s224_s17, [#allocation4], %s1673_s20, %s1673_s20, %s1674_s29  }
  0x2c   : > { %1629 = dma.done.wait (%p1787_p13), [#allocation4], 8192  }
  0x2d   : > { %1631 = vsyncadd (%p1787_p13), [#allocation4], 4294959104  ;;  %s1814_s13 = sand.u32 1, %s1646_s22   ;;  %s1282_s16 = sshll.u32 %s1654_s24, 4 }
  0x2e   : > { %s1281_s18 = sshll.u32 %s1814_s13, 2  ;;  %p294_p12 = scmp.lt.s32.totalorder %s1658_s25, 1 }
  0x2f   : > { %p296_p0 = scmp.lt.s32.totalorder %s1282_s16, 31  ;;  %s2055_s0 = sld [smem:[#allocation12_spill]] }
  0x30   : > { %s295_s12 = scalar_select %p294_p12, %s1658_s25, 1 }
  0x31   : > { %s2073_s16 = smov (!%p296_p0, %s1282_s16), 31  ;;  %s1826_s3 = scalar_lea.vmem [#allocation7], %s1281_s18 }
  0x32   : > { %s1283_s17 = sshll.u32 %s295_s12, 5  ;;  %p1285_p10 = scmp.ne.s32.totalorder %s1654_s24, 0 }
  0x33   : > { %s299_s19 = sadd.s32 %s1283_s17, %s2073_s16 }
  0x34   : > { %s1284_s20 = sshll.u32 %s299_s19, 2  ;;  %307 = sbr.rel (%p1285_p10) target bundleno = 60 (0x3c), region = 48 }
  0x35   : > { %s1823_s30 = scalar_lea.vmem %s2055_s0, %s1284_s20 }
  0x39   : > { %v1675_v0 = vmov 0.0  }
  0x3a   : > { %308 = vst [vmem:[#allocation2 + $0x10] sm:$0xff] %v1675_v0  ;;  %309 = vst [vmem:[#allocation2] sm:$0xff] %v1675_v0 }
  0x3b   : > { %310 = vst [vmem:[#allocation2 + $0x18] sm:$0xff] %v1675_v0  ;;  %311 = vst [vmem:[#allocation2 + $0x8] sm:$0xff] %v1675_v0 }
  0x3c PF: > { %s2056_s1 = sld [smem:[#allocation13_spill]]  ;;  %vm475_vm0 = vcmask 1041408   ;;  %v1676_v15 = vmov 0   ;;  %v1510_v18 = vld [vmem:[%s1823_s30] sm:$0xff]   ;;  %vm450_vm1 = vcmask 293888   ;;  %v1511_v19 = vld [vmem:[%s1823_s30 + $0x8] sm:$0xff]   ;;  %v340_v30 = vlaneseq }
  0x3d   : > { %520 = vmatprep.mubr.bf16.mxu0 %v1676_v15  ;;  %633 = vmatprep.mubr.bf16.mxu1 %v1676_v15  ;;  %v1512_v20 = vld [vmem:[%s1823_s30 + $0x10] sm:$0xff]   ;;  %v1513_v21 = vld [vmem:[%s1823_s30 + $0x18] sm:$0xff]   ;;  %v1514_v22 = vld [vmem:[%s1823_s30 + $0x20] sm:$0xff]   ;;  %p1324_p13 = scmp.ne.s32.totalorder %s1654_s24, 1 }
  0x3e   : > { %v1515_v23 = vld [vmem:[%s1823_s30 + $0x28] sm:$0xff]   ;;  %v1516_v24 = vld [vmem:[%s1823_s30 + $0x30] sm:$0xff]   ;;  %v1517_v25 = vld [vmem:[%s1823_s30 + $0x38] sm:$0xff]   ;;  %v1884_v35 = vshrl.u32 %v340_v30, 7  ;;  %s2057_s18 = scalar_lea.vmem (!%p1324_p13), [#allocation6], %s1814_s13 }
  0x3f   : > { %v338_v42 = vld [vmem:[%s2041_s2] sm:$0xf] }
  0x40   : > { %v342_v40 = vsub.s32 0, %v1884_v35  ;;  %v350_v41 = vsub.s32 2, %v1884_v35  ;;  %v346_v45 = vsub.s32 1, %v1884_v35  ;;  %v354_v46 = vsub.s32 3, %v1884_v35 }
  0x42   : > { %v336_v1 = vld [vmem:[%s2056_s1 + $0x40] sm:$0x33]  ;;  %v337_v2 = vld [vmem:[%s2056_s1 + $0x48] sm:$0x33]  ;;  %v1893_v49 = vrot.slane %v338_v42, %v342_v40  ;;  %v1895_v50 = vrot.slane %v338_v42, %v350_v41  ;;  %v1897_v53 = vrot.slane %v338_v42, %v346_v45  ;;  %v1899_v54 = vrot.slane %v338_v42, %v354_v46 }
  0x43   : > { %v1303_v3 = vcombine.high %v336_v1, %v336_v1  ;;  %v1305_v4 = vcombine.high %v337_v2, %v337_v2  ;;  %v1302_v5 = vcombine.low %v336_v1, %v336_v1  ;;  %v1304_v6 = vcombine.low %v337_v2, %v337_v2  ;;  %v1498_v7 = vld [vmem:[%s2056_s1 + $0x24] ss:$16 sps:$4 sm:$0xff]   ;;  %v1500_v8 = vld [vmem:[%s2056_s1 + $0x2c] ss:$16 sps:$4 sm:$0xff]   ;;  %v1502_v9 = vld [vmem:[%s2056_s1 + $0x20] ss:$16 sps:$4 sm:$0xff]  }
  0x44   : > { %v1503_v12 = vld [vmem:[%s2056_s1 + $0x28] ss:$16 sps:$4 sm:$0xff]   ;;  %v1504_v13 = vld [vmem:[%s2056_s1 + $0x4] ss:$16 sps:$4 sm:$0xff]   ;;  %v1506_v14 = vld [vmem:[%s2056_s1 + $0xc] ss:$16 sps:$4 sm:$0xff]  }
  0x45   : > { %1306 = vmatprep.subr.msk.bf16.mxu0 %vm475_vm0, %v1303_v3  ;;  %1315 = vmatprep.subr.msk.bf16.mxu1 %vm475_vm0, %v1305_v4  ;;  %v477_v10 = vsel %vm475_vm0, %v1302_v5, 0  ;;  %v483_v11 = vsel %vm475_vm0, %v1304_v6, 0  ;;  %v1508_v16 = vld [vmem:[%s2056_s1] ss:$16 sps:$4 sm:$0xff]   ;;  %v1509_v17 = vld [vmem:[%s2056_s1 + $0x8] ss:$16 sps:$4 sm:$0xff]  }
  0x46   : > { %499 = vmatpush1.bf16.msra.mxu0 %v477_v10  ;;  %612 = vmatpush1.bf16.msra.mxu1 %v483_v11 }
  0x47   : > { %500 = vmatprep.subr.bf16.mxu0 %v1498_v7  ;;  %613 = vmatprep.subr.bf16.mxu1 %v1500_v8 }
  0x4a   : > { %501 = vmatpush1.bf16.msra.mxu0 %v1502_v9  ;;  %614 = vmatpush1.bf16.msra.mxu1 %v1503_v12 }
  0x4b   : > { %502 = vmatprep.subr.bf16.mxu0 %v1504_v13  ;;  %615 = vmatprep.subr.bf16.mxu1 %v1506_v14 }
  0x4e   : > { %503 = vmatpush1.bf16.msra.mxu0 %v1508_v16  ;;  %616 = vmatpush1.bf16.msra.mxu1 %v1509_v17 }
  0x51   : > { %1307 = vmatmul.mubr.msk.bf16.vlgmr.msra.gmra.mxu0 %vm450_vm1, %v1510_v18  ;;  %1316 = vmatmul.mubr.msk.bf16.vlgmr.msra.gmra.mxu1 %vm450_vm1, %v1510_v18 }
  0x52   : > { %530 = vmatprep.mubr.bf16.mxu0 %v1676_v15  ;;  %643 = vmatprep.mubr.bf16.mxu1 %v1676_v15 }
  0x59   : > { %1308 = vmatmul.mubr.msk.bf16.gmra.mxu0 %vm450_vm1, %v1511_v19  ;;  %1317 = vmatmul.mubr.msk.bf16.gmra.mxu1 %vm450_vm1, %v1511_v19 }
  0x5a   : > { %540 = vmatprep.mubr.bf16.mxu0 %v1676_v15  ;;  %653 = vmatprep.mubr.bf16.mxu1 %v1676_v15 }
  0x61   : > { %1309 = vmatmul.mubr.msk.bf16.gmra.mxu0 %vm450_vm1, %v1512_v20  ;;  %1318 = vmatmul.mubr.msk.bf16.gmra.mxu1 %vm450_vm1, %v1512_v20 }
  0x62   : > { %550 = vmatprep.mubr.bf16.mxu0 %v1676_v15  ;;  %663 = vmatprep.mubr.bf16.mxu1 %v1676_v15 }
  0x69   : > { %1310 = vmatmul.mubr.msk.bf16.gmra.mxu0 %vm450_vm1, %v1513_v21  ;;  %1319 = vmatmul.mubr.msk.bf16.gmra.mxu1 %vm450_vm1, %v1513_v21 }
  0x6a   : > { %560 = vmatprep.mubr.bf16.mxu0 %v1676_v15  ;;  %673 = vmatprep.mubr.bf16.mxu1 %v1676_v15 }
  0x71   : > { %1311 = vmatmul.mubr.msk.bf16.gmra.mxu0 %vm450_vm1, %v1514_v22  ;;  %1320 = vmatmul.mubr.msk.bf16.gmra.mxu1 %vm450_vm1, %v1514_v22 }
  0x72   : > { %570 = vmatprep.mubr.bf16.mxu0 %v1676_v15  ;;  %683 = vmatprep.mubr.bf16.mxu1 %v1676_v15 }
  0x79   : > { %1312 = vmatmul.mubr.msk.bf16.gmra.mxu0 %vm450_vm1, %v1515_v23  ;;  %1321 = vmatmul.mubr.msk.bf16.gmra.mxu1 %vm450_vm1, %v1515_v23 }
  0x7a   : > { %580 = vmatprep.mubr.bf16.mxu0 %v1676_v15  ;;  %693 = vmatprep.mubr.bf16.mxu1 %v1676_v15 }
  0x81   : > { %1313 = vmatmul.mubr.msk.bf16.gmra.mxu0 %vm450_vm1, %v1516_v24  ;;  %1322 = vmatmul.mubr.msk.bf16.gmra.mxu1 %vm450_vm1, %v1516_v24 }
  0x82   : > { %590 = vmatprep.mubr.bf16.mxu0 %v1676_v15  ;;  %703 = vmatprep.mubr.bf16.mxu1 %v1676_v15 }
  0x89   : > { %1314 = vmatmul.mubr.msk.bf16.gmra.mxu0 %vm450_vm1, %v1517_v25  ;;  %1323 = vmatmul.mubr.msk.bf16.gmra.mxu1 %vm450_vm1, %v1517_v25 }
 0x111   : > { %v522_v26 = vpop.f32.mrf.mxu0  ;;  %v635_v27 = vpop.f32.mrf.mxu1 }
 0x112   : > { %v523_v59 = vadd.f32 %v522_v26, %v1893_v49  ;;  %v636_v60 = vadd.f32 %v635_v27, %v1895_v50 }
 0x113   : > { %v524_v28 = vpop.f32.mrf.mxu0  ;;  %v637_v29 = vpop.f32.mrf.mxu1 }
 0x114   : > { %v525_v1 = vadd.f32 %v524_v28, %v1897_v53  ;;  %v638_v2 = vadd.f32 %v637_v29, %v1899_v54  ;;  %v714_v9 = vmax.f32 %v523_v59, 0.0  ;;  %v716_v10 = vmax.f32 %v636_v60, 0.0 }
 0x115   : > { %v526_v31 = vpop.f32.mrf.mxu0  ;;  %v639_v32 = vpop.f32.mrf.mxu1 }
 0x116   : > { %v527_v55 = vadd.f32 %v526_v31, %v1893_v49  ;;  %v640_v56 = vadd.f32 %v639_v32, %v1895_v50  ;;  %v715_v19 = vmax.f32 %v525_v1, 0.0  ;;  %v717_v20 = vmax.f32 %v638_v2, 0.0 }
 0x117   : > { %v528_v33 = vpop.f32.mrf.mxu0  ;;  %v641_v34 = vpop.f32.mrf.mxu1 }
 0x118   : > { %v529_v61 = vadd.f32 %v528_v33, %v1897_v53  ;;  %v642_v62 = vadd.f32 %v641_v34, %v1899_v54  ;;  %v718_v3 = vmax.f32 %v527_v55, 0.0  ;;  %v720_v4 = vmax.f32 %v640_v56, 0.0 }
 0x119   : > { %v532_v36 = vpop.f32.mrf.mxu0  ;;  %v645_v37 = vpop.f32.mrf.mxu1 }
 0x11a   : > { %v533_v5 = vadd.f32 %v532_v36, %v1893_v49  ;;  %v646_v6 = vadd.f32 %v645_v37, %v1895_v50  ;;  %v719_v13 = vmax.f32 %v529_v61, 0.0  ;;  %v721_v14 = vmax.f32 %v642_v62, 0.0 }
 0x11b   : > { %v534_v38 = vpop.f32.mrf.mxu0  ;;  %v647_v39 = vpop.f32.mrf.mxu1  ;;  %v782_v23 = vadd.f32 %v718_v3, %v714_v9  ;;  %v812_v24 = vadd.f32 %v720_v4, %v716_v10 }
 0x11c   : > { %v535_v11 = vadd.f32 %v534_v38, %v1897_v53  ;;  %v648_v12 = vadd.f32 %v647_v39, %v1899_v54  ;;  %v722_v25 = vmax.f32 %v533_v5, 0.0  ;;  %v724_v26 = vmax.f32 %v646_v6, 0.0 }
 0x11d   : > { %v536_v43 = vpop.f32.mrf.mxu0  ;;  %v649_v44 = vpop.f32.mrf.mxu1  ;;  %v797_v34 = vadd.f32 %v719_v13, %v715_v19  ;;  %v827_v36 = vadd.f32 %v721_v14, %v717_v20 }
 0x11e   : > { %v537_v15 = vadd.f32 %v536_v43, %v1893_v49  ;;  %v650_v16 = vadd.f32 %v649_v44, %v1895_v50  ;;  %v723_v29 = vmax.f32 %v535_v11, 0.0  ;;  %v725_v31 = vmax.f32 %v648_v12, 0.0 }
 0x11f   : > { %v538_v47 = vpop.f32.mrf.mxu0  ;;  %v651_v48 = vpop.f32.mrf.mxu1  ;;  %v783_v45 = vadd.f32 %v782_v23, %v722_v25  ;;  %v813_v46 = vadd.f32 %v812_v24, %v724_v26 }
 0x120   : > { %v539_v21 = vadd.f32 %v538_v47, %v1897_v53  ;;  %v652_v22 = vadd.f32 %v651_v48, %v1899_v54  ;;  %v726_v37 = vmax.f32 %v537_v15, 0.0  ;;  %v728_v38 = vmax.f32 %v650_v16, 0.0 }
 0x121   : > { %v542_v51 = vpop.f32.mrf.mxu0  ;;  %v655_v52 = vpop.f32.mrf.mxu1  ;;  %v798_v55 = vadd.f32 %v797_v34, %v723_v29  ;;  %v828_v56 = vadd.f32 %v827_v36, %v725_v31 }
 0x122   : > { %v543_v32 = vadd.f32 %v542_v51, %v1893_v49  ;;  %v656_v33 = vadd.f32 %v655_v52, %v1895_v50  ;;  %v727_v41 = vmax.f32 %v539_v21, 0.0  ;;  %v729_v42 = vmax.f32 %v652_v22, 0.0 }
 0x123   : > { %v544_v57 = vpop.f32.mrf.mxu0  ;;  %v657_v58 = vpop.f32.mrf.mxu1  ;;  %v784_v61 = vadd.f32 %v783_v45, %v726_v37  ;;  %v814_v62 = vadd.f32 %v813_v46, %v728_v38 }
 0x124   : > { %v545_v43 = vadd.f32 %v544_v57, %v1897_v53  ;;  %v658_v44 = vadd.f32 %v657_v58, %v1899_v54  ;;  %v730_v59 = vmax.f32 %v543_v32, 0.0  ;;  %v732_v60 = vmax.f32 %v656_v33, 0.0 }
 0x125   : > { %v546_v63 = vpop.f32.mrf.mxu0  ;;  %v659_v0 = vpop.f32.mrf.mxu1  ;;  %v799_v3 = vadd.f32 %v798_v55, %v727_v41  ;;  %v829_v4 = vadd.f32 %v828_v56, %v729_v42 }
 0x126   : > { %v547_v47 = vadd.f32 %v546_v63, %v1893_v49  ;;  %v660_v48 = vadd.f32 %v659_v0, %v1895_v50  ;;  %v731_v5 = vmax.f32 %v545_v43, 0.0  ;;  %v733_v63 = vmax.f32 %v658_v44, 0.0 }
 0x127   : > { %v548_v7 = vpop.f32.mrf.mxu0  ;;  %v661_v8 = vpop.f32.mrf.mxu1  ;;  %v785_v13 = vadd.f32 %v784_v61, %v730_v59  ;;  %v815_v14 = vadd.f32 %v814_v62, %v732_v60 }
 0x128   : > { %v549_v1 = vadd.f32 %v548_v7, %v1897_v53  ;;  %v662_v57 = vadd.f32 %v661_v8, %v1899_v54  ;;  %v734_v6 = vmax.f32 %v547_v47, 0.0  ;;  %v736_v0 = vmax.f32 %v660_v48, 0.0 }
 0x129   : > { %v552_v17 = vpop.f32.mrf.mxu0  ;;  %v665_v18 = vpop.f32.mrf.mxu1  ;;  %v800_v23 = vadd.f32 %v799_v3, %v731_v5 }
 0x12a   : > { %v553_v9 = vadd.f32 %v552_v17, %v1893_v49  ;;  %v666_v10 = vadd.f32 %v665_v18, %v1895_v50  ;;  %v735_v15 = vmax.f32 %v549_v1, 0.0  ;;  %v737_v16 = vmax.f32 %v662_v57, 0.0 }
 0x12b   : > { %v554_v27 = vpop.f32.mrf.mxu0  ;;  %v667_v28 = vpop.f32.mrf.mxu1  ;;  %v830_v17 = vadd.f32 %v829_v4, %v733_v63  ;;  %v786_v25 = vadd.f32 %v785_v13, %v734_v6  ;;  %v816_v26 = vadd.f32 %v815_v14, %v736_v0 }
 0x12c   : > { %v555_v7 = vadd.f32 %v554_v27, %v1897_v53  ;;  %v668_v8 = vadd.f32 %v667_v28, %v1899_v54  ;;  %v738_v29 = vmax.f32 %v553_v9, 0.0  ;;  %v740_v27 = vmax.f32 %v666_v10, 0.0 }
 0x12d   : > { %v556_v39 = vpop.f32.mrf.mxu0  ;;  %v669_v40 = vpop.f32.mrf.mxu1  ;;  %v801_v37 = vadd.f32 %v800_v23, %v735_v15  ;;  %v831_v38 = vadd.f32 %v830_v17, %v737_v16 }
 0x12e   : > { %v557_v19 = vadd.f32 %v556_v39, %v1893_v49  ;;  %v670_v20 = vadd.f32 %v669_v40, %v1895_v50  ;;  %v739_v32 = vmax.f32 %v555_v7, 0.0  ;;  %v741_v33 = vmax.f32 %v668_v8, 0.0 }
 0x12f   : > { %v558_v51 = vpop.f32.mrf.mxu0  ;;  %v671_v52 = vpop.f32.mrf.mxu1  ;;  %v787_v47 = vadd.f32 %v786_v25, %v738_v29  ;;  %v817_v48 = vadd.f32 %v816_v26, %v740_v27 }
 0x130   : > { %v559_v18 = vadd.f32 %v558_v51, %v1897_v53  ;;  %v672_v24 = vadd.f32 %v671_v52, %v1899_v54  ;;  %v742_v39 = vmax.f32 %v557_v19, 0.0  ;;  %v744_v40 = vmax.f32 %v670_v20, 0.0 }
 0x131   : > { %v562_v2 = vpop.f32.mrf.mxu0  ;;  %v675_v58 = vpop.f32.mrf.mxu1  ;;  %v802_v59 = vadd.f32 %v801_v37, %v739_v32  ;;  %v832_v60 = vadd.f32 %v831_v38, %v741_v33 }
 0x132   : > { %v563_v34 = vadd.f32 %v562_v2, %v1893_v49  ;;  %v676_v36 = vadd.f32 %v675_v58, %v1895_v50  ;;  %v743_v43 = vmax.f32 %v559_v18, 0.0  ;;  %v745_v44 = vmax.f32 %v672_v24, 0.0 }
 0x133   : > { %v564_v11 = vpop.f32.mrf.mxu0  ;;  %v677_v12 = vpop.f32.mrf.mxu1  ;;  %v788_v1 = vadd.f32 %v787_v47, %v742_v39  ;;  %v818_v57 = vadd.f32 %v817_v48, %v744_v40 }
 0x134   : > { %v565_v45 = vadd.f32 %v564_v11, %v1897_v53  ;;  %v678_v46 = vadd.f32 %v677_v12, %v1899_v54  ;;  %v746_v61 = vmax.f32 %v563_v34, 0.0  ;;  %v748_v62 = vmax.f32 %v676_v36, 0.0 }
 0x135   : > { %v566_v21 = vpop.f32.mrf.mxu0  ;;  %v679_v22 = vpop.f32.mrf.mxu1  ;;  %v803_v5 = vadd.f32 %v802_v59, %v743_v43  ;;  %v833_v63 = vadd.f32 %v832_v60, %v745_v44 }
 0x136   : > { %v567_v51 = vadd.f32 %v566_v21, %v1893_v49  ;;  %v680_v52 = vadd.f32 %v679_v22, %v1895_v50  ;;  %v747_v6 = vmax.f32 %v565_v45, 0.0  ;;  %v749_v0 = vmax.f32 %v678_v46, 0.0 }
 0x137   : > { %v568_v31 = vpop.f32.mrf.mxu0  ;;  %v681_v28 = vpop.f32.mrf.mxu1  ;;  %v789_v7 = vadd.f32 %v788_v1, %v746_v61  ;;  %v819_v8 = vadd.f32 %v818_v57, %v748_v62 }
 0x138   : > { %v569_v2 = vadd.f32 %v568_v31, %v1897_v53  ;;  %v682_v58 = vadd.f32 %v681_v28, %v1899_v54  ;;  %v750_v9 = vmax.f32 %v567_v51, 0.0  ;;  %v752_v10 = vmax.f32 %v680_v52, 0.0 }
 0x139   : > { %v572_v41 = vpop.f32.mrf.mxu0  ;;  %v685_v42 = vpop.f32.mrf.mxu1  ;;  %v804_v18 = vadd.f32 %v803_v5, %v747_v6  ;;  %v834_v24 = vadd.f32 %v833_v63, %v749_v0 }
 0x13a   : > { %v573_v11 = vadd.f32 %v572_v41, %v1893_v49  ;;  %v686_v12 = vadd.f32 %v685_v42, %v1895_v50  ;;  %v751_v19 = vmax.f32 %v569_v2, 0.0  ;;  %v753_v20 = vmax.f32 %v682_v58, 0.0 }
 0x13b   : > { %v574_v55 = vpop.f32.mrf.mxu0  ;;  %v687_v56 = vpop.f32.mrf.mxu1  ;;  %v790_v29 = vadd.f32 %v789_v7, %v750_v9  ;;  %v820_v27 = vadd.f32 %v819_v8, %v752_v10 }
 0x13c   : > { %v575_v15 = vadd.f32 %v574_v55, %v1897_v53  ;;  %v688_v16 = vadd.f32 %v687_v56, %v1899_v54  ;;  %v754_v31 = vmax.f32 %v573_v11, 0.0  ;;  %v756_v28 = vmax.f32 %v686_v12, 0.0 }
 0x13d   : > { %v576_v3 = vpop.f32.mrf.mxu0  ;;  %v689_v4 = vpop.f32.mrf.mxu1  ;;  %v805_v39 = vadd.f32 %v804_v18, %v751_v19  ;;  %v835_v40 = vadd.f32 %v834_v24, %v753_v20 }
 0x13e   : > { %v577_v21 = vadd.f32 %v576_v3, %v1893_v49  ;;  %v690_v22 = vadd.f32 %v689_v4, %v1895_v50  ;;  %v755_v34 = vmax.f32 %v575_v15, 0.0  ;;  %v757_v36 = vmax.f32 %v688_v16, 0.0 }
 0x13f   : > { %v578_v13 = vpop.f32.mrf.mxu0  ;;  %v691_v14 = vpop.f32.mrf.mxu1  ;;  %v791_v51 = vadd.f32 %v790_v29, %v754_v31  ;;  %v821_v52 = vadd.f32 %v820_v27, %v756_v28 }
 0x140   : > { %v579_v25 = vadd.f32 %v578_v13, %v1897_v53  ;;  %v692_v26 = vadd.f32 %v691_v14, %v1899_v54  ;;  %v758_v41 = vmax.f32 %v577_v21, 0.0  ;;  %v760_v42 = vmax.f32 %v690_v22, 0.0 }
 0x141   : > { %v582_v23 = vpop.f32.mrf.mxu0  ;;  %v695_v17 = vpop.f32.mrf.mxu1  ;;  %v806_v61 = vadd.f32 %v805_v39, %v755_v34  ;;  %v836_v62 = vadd.f32 %v835_v40, %v757_v36 }
 0x142   : > { %v583_v37 = vadd.f32 %v582_v23, %v1893_v49  ;;  %v696_v38 = vadd.f32 %v695_v17, %v1895_v50  ;;  %v759_v45 = vmax.f32 %v579_v25, 0.0  ;;  %v761_v46 = vmax.f32 %v692_v26, 0.0 }
 0x143   : > { %v584_v32 = vpop.f32.mrf.mxu0  ;;  %v697_v33 = vpop.f32.mrf.mxu1  ;;  %v792_v2 = vadd.f32 %v791_v51, %v758_v41  ;;  %v822_v58 = vadd.f32 %v821_v52, %v760_v42 }
 0x144   : > { %v585_v55 = vadd.f32 %v584_v32, %v1897_v53  ;;  %v698_v56 = vadd.f32 %v697_v33, %v1899_v54  ;;  %v762_v1 = vmax.f32 %v583_v37, 0.0  ;;  %v764_v57 = vmax.f32 %v696_v38, 0.0 }
 0x145   : > { %v586_v43 = vpop.f32.mrf.mxu0  ;;  %v699_v44 = vpop.f32.mrf.mxu1  ;;  %v807_v6 = vadd.f32 %v806_v61, %v759_v45  ;;  %v837_v0 = vadd.f32 %v836_v62, %v761_v46 }
 0x146   : > { %v587_v47 = vadd.f32 %v586_v43, %v1893_v49  ;;  %v700_v48 = vadd.f32 %v699_v44, %v1895_v50  ;;  %v763_v11 = vmax.f32 %v585_v55, 0.0  ;;  %v765_v12 = vmax.f32 %v698_v56, 0.0  ;;  %v778_v43 = vld [vmem:[#allocation2 + $0x10] sm:$0xff]  ;;  %v780_v44 = vld [vmem:[#allocation2 + $0x18] sm:$0xff] }
 0x147   : > { %v588_v59 = vpop.f32.mrf.mxu0  ;;  %v701_v60 = vpop.f32.mrf.mxu1  ;;  %v793_v15 = vadd.f32 %v792_v2, %v762_v1  ;;  %v823_v16 = vadd.f32 %v822_v58, %v764_v57 }
 0x148   : > { %v589_v3 = vadd.f32 %v588_v59, %v1897_v53  ;;  %v702_v4 = vadd.f32 %v701_v60, %v1899_v54  ;;  %v766_v9 = vmax.f32 %v587_v47, 0.0  ;;  %v768_v10 = vmax.f32 %v700_v48, 0.0  ;;  %v779_v59 = vld [vmem:[#allocation2] sm:$0xff]  ;;  %v781_v60 = vld [vmem:[#allocation2 + $0x8] sm:$0xff] }
 0x149   : > { %v592_v5 = vpop.f32.mrf.mxu0  ;;  %v705_v63 = vpop.f32.mrf.mxu1  ;;  %v808_v31 = vadd.f32 %v807_v6, %v763_v11  ;;  %v838_v28 = vadd.f32 %v837_v0, %v765_v12 }
 0x14a   : > { %v593_v13 = vadd.f32 %v592_v5, %v1893_v49  ;;  %v706_v14 = vadd.f32 %v705_v63, %v1895_v50  ;;  %v767_v21 = vmax.f32 %v589_v3, 0.0  ;;  %v769_v22 = vmax.f32 %v702_v4, 0.0 }
 0x14b   : > { %v594_v7 = vpop.f32.mrf.mxu0  ;;  %v707_v8 = vpop.f32.mrf.mxu1  ;;  %v794_v25 = vadd.f32 %v793_v15, %v766_v9  ;;  %v824_v26 = vadd.f32 %v823_v16, %v768_v10 }
 0x14c   : > { %v595_v19 = vadd.f32 %v594_v7, %v1897_v53  ;;  %v708_v20 = vadd.f32 %v707_v8, %v1899_v54  ;;  %v770_v23 = vmax.f32 %v593_v13, 0.0  ;;  %v772_v17 = vmax.f32 %v706_v14, 0.0 }
 0x14d   : > { %v596_v18 = vpop.f32.mrf.mxu0  ;;  %v709_v24 = vpop.f32.mrf.mxu1  ;;  %v809_v41 = vadd.f32 %v808_v31, %v767_v21  ;;  %v839_v42 = vadd.f32 %v838_v28, %v769_v22 }
 0x14e   : > { %v597_v29 = vadd.f32 %v596_v18, %v1893_v49  ;;  %v710_v27 = vadd.f32 %v709_v24, %v1895_v50  ;;  %v771_v32 = vmax.f32 %v595_v19, 0.0  ;;  %v773_v33 = vmax.f32 %v708_v20, 0.0 }
 0x14f   : > { %v598_v34 = vpop.f32.mrf.mxu0  ;;  %v711_v36 = vpop.f32.mrf.mxu1  ;;  %v795_v37 = vadd.f32 %v794_v25, %v770_v23  ;;  %v825_v38 = vadd.f32 %v824_v26, %v772_v17 }
 0x150   : > { %v774_v39 = vmax.f32 %v597_v29, 0.0  ;;  %v776_v40 = vmax.f32 %v710_v27, 0.0  ;;  %v599_v45 = vadd.f32 %v598_v34, %v1897_v53  ;;  %v712_v49 = vadd.f32 %v711_v36, %v1899_v54 }
 0x151   : > { %v810_v47 = vadd.f32 %v809_v41, %v771_v32  ;;  %v840_v48 = vadd.f32 %v839_v42, %v773_v33 }
 0x152   : > { %v796_v46 = vadd.f32 %v795_v37, %v774_v39  ;;  %v826_v50 = vadd.f32 %v825_v38, %v776_v40  ;;  %v775_v51 = vmax.f32 %v599_v45, 0.0  ;;  %v777_v52 = vmax.f32 %v712_v49, 0.0 }
 0x154   : > { %v842_v55 = vadd.f32 %v796_v46, %v778_v43  ;;  %v844_v56 = vadd.f32 %v826_v50, %v780_v44  ;;  %v811_v61 = vadd.f32 %v810_v47, %v775_v51  ;;  %v841_v62 = vadd.f32 %v840_v48, %v777_v52  ;;  %853 = sbr.rel (%p1324_p13) target bundleno = 582 (0x246), region = 52 }
 0x156   : > { %846 = vst [vmem:[#allocation2 + $0x10] sm:$0xff] %v842_v55  ;;  %848 = vst [vmem:[#allocation2 + $0x18] sm:$0xff] %v844_v56  ;;  %v843_v1 = vadd.f32 %v811_v61, %v779_v59  ;;  %v845_v57 = vadd.f32 %v841_v62, %v781_v60 }
 0x158   : > { %847 = vst [vmem:[#allocation2] sm:$0xff] %v843_v1  ;;  %849 = vst [vmem:[#allocation2 + $0x8] sm:$0xff] %v845_v57 }
 0x159   : > { %v917_v53 = vld [vmem:[#allocation3 + $0xf8] sm:$0xff]  ;;  %v916_v3 = vld [vmem:[#allocation3 + $0xf0] sm:$0xff]  ;;  %v915_v6 = vld [vmem:[#allocation3 + $0xe8] sm:$0xff]  ;;  %vm1122_vm2 = vcmp.lt.s32.totalorder %v340_v30, 512 }
 0x15a   : > { %v949_v54 = vld [vmem:[#allocation3 + $0x1f8] sm:$0xff]  ;;  %1332 = vmatprep.subr.mxu0 %v917_v53  ;;  %v948_v4 = vld [vmem:[#allocation3 + $0x1f0] sm:$0xff]  ;;  %v947_v0 = vld [vmem:[#allocation3 + $0x1e8] sm:$0xff] }
 0x15b   : > { %v901_v2 = vld [vmem:[#allocation3 + $0x78] sm:$0xff]  ;;  %1367 = vmatprep.subr.mxu1 %v949_v54  ;;  %v900_v5 = vld [vmem:[#allocation3 + $0x70] sm:$0xff]  ;;  %v899_v9 = vld [vmem:[#allocation3 + $0x68] sm:$0xff] }
 0x15c   : > { %v933_v58 = vld [vmem:[#allocation3 + $0x178] sm:$0xff]  ;;  %1333 = vmatpush3.msra.mxu0 %v901_v2  ;;  %v932_v63 = vld [vmem:[#allocation3 + $0x170] sm:$0xff]  ;;  %v931_v10 = vld [vmem:[#allocation3 + $0x168] sm:$0xff] }
 0x15d   : > { %1368 = vmatpush3.msra.mxu1 %v933_v58  ;;  %1334 = vmatprep.subr.mxu0 %v916_v3  ;;  %v914_v11 = vld [vmem:[#allocation3 + $0xe0] sm:$0xff]  ;;  %v913_v7 = vld [vmem:[#allocation3 + $0xd8] sm:$0xff]  ;;  %v912_v19 = vld [vmem:[#allocation3 + $0xd0] sm:$0xff] }
 0x15e   : > { %1369 = vmatprep.subr.mxu1 %v948_v4  ;;  %1335 = vmatpush3.msra.mxu0 %v900_v5  ;;  %v946_v12 = vld [vmem:[#allocation3 + $0x1e0] sm:$0xff]  ;;  %v945_v8 = vld [vmem:[#allocation3 + $0x1d8] sm:$0xff]  ;;  %v944_v20 = vld [vmem:[#allocation3 + $0x1d0] sm:$0xff] }
 0x15f   : > { %1370 = vmatpush3.msra.mxu1 %v932_v63  ;;  %1336 = vmatprep.subr.mxu0 %v915_v6  ;;  %v898_v13 = vld [vmem:[#allocation3 + $0x60] sm:$0xff]  ;;  %v897_v15 = vld [vmem:[#allocation3 + $0x58] sm:$0xff]  ;;  %v896_v21 = vld [vmem:[#allocation3 + $0x50] sm:$0xff] }
 0x160   : > { %1371 = vmatprep.subr.mxu1 %v947_v0  ;;  %v930_v14 = vld [vmem:[#allocation3 + $0x160] sm:$0xff]  ;;  %1337 = vmatpush3.msra.mxu0 %v899_v9  ;;  %v929_v16 = vld [vmem:[#allocation3 + $0x158] sm:$0xff]  ;;  %v928_v22 = vld [vmem:[#allocation3 + $0x150] sm:$0xff]  ;;  %v1677_v9 = vmov 1966171168  }
 0x161   : > { %1372 = vmatpush3.msra.mxu1 %v931_v10  ;;  %1338 = vmatprep.subr.mxu0 %v914_v11  ;;  %v911_v23 = vld [vmem:[#allocation3 + $0xc8] sm:$0xff]  ;;  %v910_v25 = vld [vmem:[#allocation3 + $0xc0] sm:$0xff]  ;;  %v909_v31 = vld [vmem:[#allocation3 + $0xb8] sm:$0xff]  ;;  %v1098_v10 = vunpack.c.l.s4 %v1677_v9 }
 0x162   : > { %1373 = vmatprep.subr.mxu1 %v946_v12  ;;  %1339 = vmatpush3.msra.mxu0 %v898_v13  ;;  %v943_v17 = vld [vmem:[#allocation3 + $0x1c8] sm:$0xff]  ;;  %v942_v26 = vld [vmem:[#allocation3 + $0x1c0] sm:$0xff]  ;;  %v941_v28 = vld [vmem:[#allocation3 + $0x1b8] sm:$0xff] }
 0x163   : > { %1374 = vmatpush3.msra.mxu1 %v930_v14  ;;  %1340 = vmatprep.subr.mxu0 %v913_v7  ;;  %v895_v18 = vld [vmem:[#allocation3 + $0x48] sm:$0xff]  ;;  %v894_v29 = vld [vmem:[#allocation3 + $0x40] sm:$0xff]  ;;  %v893_v32 = vld [vmem:[#allocation3 + $0x38] sm:$0xff] }
 0x164   : > { %1375 = vmatprep.subr.mxu1 %v945_v8  ;;  %1341 = vmatpush3.msra.mxu0 %v897_v15  ;;  %v927_v24 = vld [vmem:[#allocation3 + $0x148] sm:$0xff]  ;;  %v926_v27 = vld [vmem:[#allocation3 + $0x140] sm:$0xff]  ;;  %v925_v33 = vld [vmem:[#allocation3 + $0x138] sm:$0xff] }
 0x165   : > { %1376 = vmatpush3.msra.mxu1 %v929_v16  ;;  %1342 = vmatprep.subr.mxu0 %v912_v19  ;;  %v908_v34 = vld [vmem:[#allocation3 + $0xb0] sm:$0xff]  ;;  %v907_v39 = vld [vmem:[#allocation3 + $0xa8] sm:$0xff]  ;;  %v906_v43 = vld [vmem:[#allocation3 + $0xa0] sm:$0xff] }
 0x166   : > { %1377 = vmatprep.subr.mxu1 %v944_v20  ;;  %1343 = vmatpush3.msra.mxu0 %v896_v21  ;;  %v940_v36 = vld [vmem:[#allocation3 + $0x1b0] sm:$0xff]  ;;  %v939_v40 = vld [vmem:[#allocation3 + $0x1a8] sm:$0xff]  ;;  %v938_v44 = vld [vmem:[#allocation3 + $0x1a0] sm:$0xff] }
 0x167   : > { %1378 = vmatpush3.msra.mxu1 %v928_v22  ;;  %1344 = vmatprep.subr.mxu0 %v911_v23  ;;  %v892_v37 = vld [vmem:[#allocation3 + $0x30] sm:$0xff]  ;;  %v891_v41 = vld [vmem:[#allocation3 + $0x28] sm:$0xff]  ;;  %v890_v45 = vld [vmem:[#allocation3 + $0x20] sm:$0xff] }
 0x168   : > { %1379 = vmatprep.subr.mxu1 %v943_v17  ;;  %1345 = vmatpush3.msra.mxu0 %v895_v18  ;;  %v924_v38 = vld [vmem:[#allocation3 + $0x130] sm:$0xff]  ;;  %v923_v42 = vld [vmem:[#allocation3 + $0x128] sm:$0xff]  ;;  %v922_v49 = vld [vmem:[#allocation3 + $0x120] sm:$0xff]  ;;  %v1099_v18 = vunpack.c.0.s8 %v1098_v10 }
 0x169   : > { %1380 = vmatpush3.msra.mxu1 %v927_v24  ;;  %1346 = vmatprep.subr.mxu0 %v910_v25  ;;  %v905_v46 = vld [vmem:[#allocation3 + $0x98] sm:$0xff]  ;;  %v854_v50 = vld [vmem:[#allocation2 + $0x10] sm:$0xff]  ;;  %v855_v47 = vld [vmem:[#allocation2] sm:$0xff] }
 0x16a   : > { %1381 = vmatprep.subr.mxu1 %v942_v26  ;;  %1347 = vmatpush3.msra.mxu0 %v894_v29  ;;  %v937_v48 = vld [vmem:[#allocation3 + $0x198] sm:$0xff]  ;;  %v858_v51 = vrot.slane %v854_v50, 4  ;;  %v864_v52 = vrot.slane %v855_v47, 4  ;;  %v857_v56 = vld [vmem:[#allocation2 + $0x8] sm:$0xff]  ;;  %v904_v1 = vld [vmem:[#allocation3 + $0x90] sm:$0xff] }
 0x16b   : > { %1382 = vmatpush3.msra.mxu1 %v926_v27  ;;  %1348 = vmatprep.subr.mxu0 %v909_v31  ;;  %v856_v55 = vld [vmem:[#allocation2 + $0x18] sm:$0xff]  ;;  %v876_v62 = vrot.slane %v857_v56, 4  ;;  %v936_v57 = vld [vmem:[#allocation3 + $0x190] sm:$0xff]  ;;  %v903_v5 = vld [vmem:[#allocation3 + $0x88] sm:$0xff] }
 0x16c   : > { %1383 = vmatprep.subr.mxu1 %v941_v28  ;;  %1349 = vmatpush3.msra.mxu0 %v893_v32  ;;  %v889_v59 = vld [vmem:[#allocation3 + $0x18] sm:$0xff]  ;;  %v870_v61 = vrot.slane %v856_v55, 4  ;;  %v859_v53 = vadd.f32 %v858_v51, %v854_v50  ;;  %v865_v54 = vadd.f32 %v864_v52, %v855_v47  ;;  %v888_v2 = vld [vmem:[#allocation3 + $0x10] sm:$0xff]  ;;  %v935_v63 = vld [vmem:[#allocation3 + $0x188] sm:$0xff] }
 0x16d   : > { %1384 = vmatpush3.msra.mxu1 %v925_v33  ;;  %1350 = vmatprep.subr.mxu0 %v908_v34  ;;  %v921_v60 = vld [vmem:[#allocation3 + $0x118] sm:$0xff]  ;;  %v920_v58 = vld [vmem:[#allocation3 + $0x110] sm:$0xff]  ;;  %v877_v4 = vadd.f32 %v876_v62, %v857_v56  ;;  %v887_v11 = vld [vmem:[#allocation3 + $0x8] sm:$0xff]  ;;  %v1102_v33 = vsub.s32 %v1099_v18, %v1884_v35 }
 0x16e   : > { %1385 = vmatprep.subr.mxu1 %v940_v36  ;;  %1351 = vmatpush3.msra.mxu0 %v892_v37  ;;  %v871_v3 = vadd.f32 %v870_v61, %v856_v55  ;;  %v860_v6 = vrot.slane %v859_v53, 2  ;;  %v866_v0 = vrot.slane %v865_v54, 2  ;;  %v919_v12 = vld [vmem:[#allocation3 + $0x108] sm:$0xff]  ;;  %v902_v7 = vld [vmem:[#allocation3 + $0x80] sm:$0xff] }
 0x16f   : > { %1386 = vmatpush3.msra.mxu1 %v924_v38  ;;  %1352 = vmatprep.subr.mxu0 %v907_v39  ;;  %v878_v14 = vrot.slane %v877_v4, 2  ;;  %v934_v8 = vld [vmem:[#allocation3 + $0x180] sm:$0xff] }
 0x170   : > { %1387 = vmatprep.subr.mxu1 %v939_v40  ;;  %1353 = vmatpush3.msra.mxu0 %v891_v41  ;;  %v872_v13 = vrot.slane %v871_v3, 2  ;;  %v861_v15 = vadd.f32 %v860_v6, %v859_v53  ;;  %v867_v16 = vadd.f32 %v866_v0, %v865_v54  ;;  %v886_v19 = vld [vmem:[#allocation3] sm:$0xff] }
 0x171   : > { %1388 = vmatpush3.msra.mxu1 %v923_v42  ;;  %1354 = vmatprep.subr.mxu0 %v906_v43  ;;  %v918_v20 = vld [vmem:[#allocation3 + $0x100] sm:$0xff]  ;;  %v879_v22 = vadd.f32 %v878_v14, %v877_v4 }
 0x172   : > { %1389 = vmatprep.subr.mxu1 %v938_v44  ;;  %1355 = vmatpush3.msra.mxu0 %v890_v45  ;;  %v873_v21 = vadd.f32 %v872_v13, %v871_v3  ;;  %v862_v23 = vrot.slane %v861_v15, 1  ;;  %v868_v17 = vrot.slane %v867_v16, 1  ;;  %v950_v35 = vld [vmem:[%s2043_s4] sm:$0x1] }
 0x173   : > { %1390 = vmatpush3.msra.mxu1 %v922_v49  ;;  %1356 = vmatprep.subr.mxu0 %v905_v46  ;;  %v880_v25 = vrot.slane %v879_v22, 1 }
 0x174   : > { %1391 = vmatprep.subr.mxu1 %v937_v48  ;;  %1357 = vmatpush3.msra.mxu0 %v889_v59  ;;  %v874_v24 = vrot.slane %v873_v21, 1  ;;  %v863_v26 = vadd.f32 %v862_v23, %v861_v15  ;;  %v869_v29 = vadd.f32 %v868_v17, %v867_v16 }
 0x175   : > { %1392 = vmatpush3.msra.mxu1 %v921_v60  ;;  %1358 = vmatprep.subr.mxu0 %v904_v1  ;;  %v881_v31 = vadd.f32 %v880_v25, %v879_v22 }
 0x176   : > { %1393 = vmatprep.subr.mxu1 %v936_v57  ;;  %1359 = vmatpush3.msra.mxu0 %v888_v2  ;;  %v875_v27 = vadd.f32 %v874_v24, %v873_v21  ;;  %v882_v28 = vmul.f32 0.00390625, %v863_v26  ;;  %v883_v32 = vmul.f32 0.00390625, %v869_v29 }
 0x177   : > { %1394 = vmatpush3.msra.mxu1 %v920_v58  ;;  %1360 = vmatprep.subr.mxu0 %v903_v5  ;;  %v885_v36 = vmul.f32 0.00390625, %v881_v31 }
 0x178   : > { %1395 = vmatprep.subr.mxu1 %v935_v63  ;;  %1361 = vmatpush3.msra.mxu0 %v887_v11  ;;  %v884_v34 = vmul.f32 0.00390625, %v875_v27  ;;  %v1095_v37 = vcombine.low %v882_v28, %v883_v32 }
 0x179   : > { %1396 = vmatpush3.msra.mxu1 %v919_v12  ;;  %1362 = vmatprep.subr.mxu0 %v902_v7 }
 0x17a   : > { %1397 = vmatprep.subr.mxu1 %v934_v8  ;;  %1363 = vmatpush3.msra.mxu0 %v886_v19  ;;  %v1096_v38 = vcombine.low %v884_v34, %v885_v36  ;;  %v1103_v39 = vrot.slane %v1095_v37, %v1102_v33 }
 0x17b   : > { %1398 = vmatpush3.msra.mxu1 %v918_v20  ;;  %1015 = vmatprep.mubr.f32.mxu0 %v883_v32 }
 0x17c   : > { %1085 = vmatprep.mubr.f32.mxu1 %v885_v36  ;;  %1016 = vmatmul.mubr.f32.vlgmr.msra.gmra.mxu0 %v882_v28  ;;  %v1110_v40 = vrot.slane %v1096_v38, %v1102_v33 }
 0x17d   : > { %1086 = vmatmul.mubr.f32.vlgmr.msra.gmra.mxu1 %v884_v34 }
 0x17e   : > { %v1111_v41 = vcombine.low %v1103_v39, %v1110_v40 }
 0x180   : > { %v1118_v42 = vrot.slane %v1111_v41, %v1102_v33 }
 0x182   : > { %1124 = vst.msk [vmem:[%s1826_s3] sm:$0xf] %vm1122_vm2, %v1118_v42 }
 0x23c   : > { %v1364_v43 = vpop.f32.mrf.mxu0 }
 0x23d   : > { %v1399_v44 = vpop.f32.mrf.mxu1 }
 0x23e   : > { %v1365_v45 = vpop.f32.mrf.mxu0 }
 0x23f   : > { %v1366_v49 = vadd.f32 %v1365_v45, %v1364_v43  ;;  %v1400_v46 = vpop.f32.mrf.mxu1 }
 0x240   : > { %v1401_v47 = vadd.f32 %v1400_v46, %v1399_v44 }
 0x241   : > { %v1018_v50 = vadd.f32 %v1366_v49, %v950_v35 }
 0x243   : > { %v1088_v48 = vadd.f32 %v1401_v47, %v1018_v50 }
 0x245   : > { %1125 = vst [vmem:[%s2057_s18] sm:$0x1] %v1088_v48 }
 0x246 PF: > { %s1326_s20 = sshll.u32 %s1658_s25, 4  ;;  %s2058_s12 = scalar_lea.vmem [#allocation6], %s1814_s13 }
 0x247   : > { %s1142_s14 = scalar_lea.hbm %s2044_s5, %s1326_s20  ;;  %s1144_s16 = sshll.u32 %s2058_s12, 4  ;;  %s1145_s16 = int_to_ptr.vmem [resolvable:$true] %s1144_s16 }
 0x248   : > { %s1127_s30 = scalar_lea.sflag [#allocation5], %s1814_s13  ;;  %s1544_s17 = scalar_lea.vmem %s1145_s16, 16 }
 0x249   : > { %p1545_p1 = scmp.ne.s32.totalorder %s1145_s16, %s1544_s17  ;;  %s1678_s24 = smov [#allocation6]  }
 0x24a   : > { %s1548_s19 = sshll.u32 %s1678_s24, 4  ;;  %s1549_s19 = int_to_ptr.vmem [resolvable:$false] %s1548_s19 }
 0x24b   : > { %p1546_p2 = pnand %p1545_p1, %p1765_p3  ;;  %s1550_s18 = scalar_lea.vmem %s1549_s19, 32 }
 0x24c   : > { %p1551_p5 = scmp.lt.s32.totalorder %s1145_s16, %s1549_s19  ;;  %p1552_p6 = scmp.lt.s32.totalorder %s1550_s18, %s1544_s17 }
 0x24d   : > { %p1547_p4 = pneg %p1546_p2 }
 0x24e   : > { %p1553_p7 = por %p1552_p6, %p1551_p5 }
 0x250   : > { %p1554_p8 = pnand %p1553_p7, %p1547_p4 }
 0x252   : > { %1557 = shalt.err (!%p1554_p8)
}
 0x253   : > { %s1558_s9 = scalar_lea.hbm %s1142_s14, 16  ;;  %s1562_s12 = scalar_lea.hbm %s2044_s5, 32 }
 0x254   : > { %p1559_p11 = scmp.ne.s32.totalorder %s1142_s14, %s1558_s9  ;;  %p1563_p10 = scmp.lt.s32.totalorder %s1142_s14, %s2044_s5 }
 0x255   : > { %p1564_p13 = scmp.lt.s32.totalorder %s1562_s12, %s1558_s9 }
 0x256   : > { %p1560_p12 = pnand %p1559_p11, %p1765_p3 }
 0x257   : > { %p1565_p1 = por %p1564_p13, %p1563_p10 }
 0x258   : > { %p1561_p0 = pneg %p1560_p12 }
 0x25a   : > { %p1566_p2 = pnand %p1565_p1, %p1561_p0 }
 0x25c   : > { %1569 = shalt.err (!%p1566_p2)
}
 0x25d   : > { %1406 = dma.vmem_to_hbm [thread:$0]  (%p1765_p3), %s1145_s16, 16, %s1142_s14, %s1127_s30  }
 0x25e   : > { %s1331_s17 = sshll.u32 %s1658_s25, 6  ;;  %s1158_s24 = sshll.u32 %s1826_s3, 4  ;;  %s1159_s24 = int_to_ptr.vmem [resolvable:$true] %s1158_s24 }
 0x25f   : > { %s1156_s20 = scalar_lea.hbm %s2045_s6, %s1331_s17  ;;  %s1131_s0 = scalar_lea.sflag [#allocation8], %s1814_s13 }
 0x260   : > { %s1570_s1 = scalar_lea.vmem %s1159_s24, 64  ;;  %s1679_s9 = smov [#allocation7]  }
 0x261   : > { %p1571_p4 = scmp.ne.s32.totalorder %s1159_s24, %s1570_s1  ;;  %s1574_s29 = sshll.u32 %s1679_s9, 4  ;;  %s1575_s29 = int_to_ptr.vmem [resolvable:$false] %s1574_s29 }
 0x262   : > { %s1576_s12 = scalar_lea.vmem %s1575_s29, 128  ;;  %p1577_p7 = scmp.lt.s32.totalorder %s1159_s24, %s1575_s29 }
 0x263   : > { %p1572_p5 = pnand %p1571_p4, %p1765_p3  ;;  %p1578_p8 = scmp.lt.s32.totalorder %s1576_s12, %s1570_s1 }
 0x265   : > { %p1573_p6 = pneg %p1572_p5  ;;  %p1579_p11 = por %p1578_p8, %p1577_p7 }
 0x267   : > { %p1580_p12 = pnand %p1579_p11, %p1573_p6 }
 0x269   : > { %1583 = shalt.err (!%p1580_p12)
}
 0x26a   : > { %s1584_s3 = scalar_lea.hbm %s1156_s20, 64  ;;  %s1588_s14 = scalar_lea.hbm %s2045_s6, 128 }
 0x26b   : > { %p1585_p0 = scmp.ne.s32.totalorder %s1156_s20, %s1584_s3  ;;  %p1589_p1 = scmp.lt.s32.totalorder %s1156_s20, %s2045_s6 }
 0x26c   : > { %p1590_p2 = scmp.lt.s32.totalorder %s1588_s14, %s1584_s3 }
 0x26d   : > { %p1586_p10 = pnand %p1585_p0, %p1765_p3 }
 0x26e   : > { %p1591_p4 = por %p1590_p2, %p1589_p1 }
 0x26f   : > { %p1587_p13 = pneg %p1586_p10 }
 0x271   : > { %p1592_p5 = pnand %p1591_p4, %p1587_p13 }
 0x273   : > { %1595 = shalt.err (!%p1592_p5)
}
 0x274   : > { %1407 = dma.vmem_to_hbm [thread:$0]  (%p1765_p3), %s1159_s24, 64, %s1156_s20, %s1131_s0  }
 0x275 PF: > { %p1423_p6 = scmp.ge.s32.totalorder %s1670_s28, 2  ;;  %s1170_s17 = sand.u32 1, %s1642_s21  }
 0x276   : > { %s1171_s19 = scalar_lea.sflag [#allocation5], %s1170_s17 }
 0x277   : > { %p1415_p7 = pnand %p1423_p6, %p1775_p9 }
 0x279   : > { %p1416_p8 = pneg %p1415_p7 }
 0x27b   : > { %1633 = dma.done.wait (%p1416_p8), %s1171_s19, 16  }
 0x27c   : > { %1635 = vsyncadd (%p1416_p8), %s1171_s19, 4294967280  ;;  %s1179_s18 = scalar_lea.sflag [#allocation8], %s1170_s17 }
 0x27d   : > { %1637 = dma.done.wait (%p1416_p8), %s1179_s18, 64  }
 0x27e   : > { %1639 = vsyncadd (%p1416_p8), %s1179_s18, 4294967232  ;;  %s24_s28 = sadd.s32 1, %s1670_s28   ;;  %s2059_s21 = smov %s1646_s22 }
 0x27f   : > { %p21_p11 = scmp.ge.s32.totalorder %s24_s28, 6   ;;  %s2060_s22 = smov %s1650_s23 }
 0x280   : > { %s2061_s23 = smov %s1792_s15  ;;  %s2062_s24 = smov %s1662_s26 }
 0x281   : > { %s2063_s25 = smov %s1666_s27  ;;  %s2064_s26 = smov %s2067_s7 }
 0x282   : > { %s2065_s27 = smov %s2071_s8  ;;  %23 = sbr.rel (!%p21_p11) target bundleno = 12 (0xc), region = 105 }
 0x287   :  { %1184 = vsyncpa [#allocation4], 1 }
 0x288   :  { %1186 = vsyncpa [#allocation4 + $0x1], 1 }
 0x289   :  { %1187 = vsyncpa [#allocation5], 1 }
 0x28a   :  { %1189 = vsyncpa [#allocation5 + $0x1], 1 }
 0x28b   :  { %1190 = vsyncpa [#allocation8], 1 }
 0x28c   :  { %1192 = vsyncpa [#allocation8 + $0x1], 1 }

</bundles_post_ra>
